<compile_context>
chip_gen: v7x
topology: tpu7x:2x2x1
jax: 0.10.0
libtpu: 0.0.40
codegen_flags: <defaults>
</compile_context>

<pallas_src>
import jax
import jax.numpy as jnp
from jax.experimental import pallas as pl
from jax.experimental.pallas import tpu as pltpu

_LANE = 128


def _round_up(n, m):
    return ((n + m - 1) // m) * m


# ----------------------------- kernel body -----------------------------------

def _mlp_kernel(x_ref, w1_ref, b1_ref, w2_ref, b2_ref, w3_ref, b3_ref, o_ref):
    # In-kernel f32 -> bf16 cast of the x tile (saves a separate HBM cast pass).
    x = x_ref[...].astype(w1_ref.dtype)

    # Layer 1: Linear(D, 128) + ReLU         (Dropout = identity in eval)
    h1 = jnp.dot(x, w1_ref[...], preferred_element_type=jnp.float32)
    h1 = jnp.maximum(h1 + b1_ref[...], 0.0)

    # Layer 2: Linear(128, 64 padded->128) + ReLU (padded lanes stay exactly 0)
    h2 = jnp.dot(h1.astype(w2_ref.dtype), w2_ref[...],
                 preferred_element_type=jnp.float32)
    h2 = jnp.maximum(h2 + b2_ref[...], 0.0)

    # Layer 3: Linear(64, num_classes) -> logits (output last dim == C, unpadded)
    out = jnp.dot(h2.astype(w3_ref.dtype), w3_ref[...],
                  preferred_element_type=jnp.float32)
    o_ref[...] = (out + b3_ref[...]).astype(o_ref.dtype)


# ------------------------- one-time param preparation -------------------------

def prepare_params(params, compute_dtype=jnp.bfloat16):
    """Pad / cast weights once (NOT per forward call).

    Returns bf16 weights and f32 biases laid out for the kernel:
      w1: [D, 128] bf16      b1: [1, 128] f32
      w2: [128, 128] bf16    b2: [1, 128] f32   (cols 64..127 are zero)
      w3: [128, C] bf16      b3: [1, C]  f32    (rows 64..127 are zero)
    Padded H2 lanes are provably zero (zero W2 cols + zero b2 + ReLU), and the
    zero W3 rows make them inert in the last matmul.
    """
    w1, b1, w2, b2, w3, b3 = params
    H2 = w2.shape[1]
    H2p = _round_up(H2, _LANE)

    b1 = jnp.reshape(b1, (1, -1)).astype(jnp.float32)
    b2 = jnp.reshape(b2, (1, -1)).astype(jnp.float32)
    b3 = jnp.reshape(b3, (1, -1)).astype(jnp.float32)

    if H2p != H2:
        w2 = jnp.pad(w2, ((0, 0), (0, H2p - H2)))
        b2 = jnp.pad(b2, ((0, 0), (0, H2p - H2)))
        w3 = jnp.pad(w3, ((0, H2p - H2), (0, 0)))

    return (w1.astype(compute_dtype), b1,
            w2.astype(compute_dtype), b2,
            w3.astype(compute_dtype), b3)


# ------------------------------ tiling heuristics -----------------------------

def _vmem_capacity_bytes():
    try:
        return int(pltpu.get_tpu_info().vmem_capacity_bytes)
    except Exception:
        return 64 * 1024 * 1024  # conservative (v7x per-TC physical VMEM)


def _tile_vmem_bytes(block_m, D, H2p, C):
    x_tiles = 2 * block_m * D * 4            # double-buffered f32 x tiles
    o_tiles = 2 * block_m * C * 4            # double-buffered f32 out tiles
    w_bytes = 2 * ((D * 128 + 128 * H2p + H2p * C) * 2
                   + (128 + H2p + C) * 4)    # weights + biases (2 buffers, worst case)
    scratch = 2 * block_m * 128 * 4          # h1 + h2 f32 intermediates
    return x_tiles + o_tiles + w_bytes + scratch


def _pick_block_m(B, D, H2p, C, vmem_budget_bytes):
    if B < 128:
        return _round_up(max(B, 16), 16)          # single tile, 16-row aligned
    if B < 1024:
        cand = _round_up(pl.cdiv(B, 2), 16)       # >=2 tiles -> both v7x TCs busy
    else:
        cand = 2048                               # overhead-bound regime: go big
    while cand > 128 and _tile_vmem_bytes(cand, D, H2p, C) > vmem_budget_bytes:
        cand //= 2
    return max(_round_up(cand, 16), 16)


# ---------------------------------- forward -----------------------------------

def nsl_model_forward(x, prepared_params, *, block_m=None):
    """Fused MLP forward. x: [B, input_dim] f32. Returns [B, num_classes] f32.

    `prepared_params` must come from prepare_params() (pre-padded, bf16).
    """
    w1, b1, w2, b2, w3, b3 = prepared_params
    B, D = x.shape
    H1 = w1.shape[1]          # 128
    H2p = w2.shape[1]         # 128 (padded)
    C = w3.shape[1]           # num_classes (unpadded)

    vmem_cap = _vmem_capacity_bytes()
    vmem_budget = min(int(0.6 * vmem_cap), 48 * 1024 * 1024)  # v7x-safe cap
    if block_m is None:
        block_m = _pick_block_m(B, D, H2p, C, vmem_budget)

    grid = (pl.cdiv(B, block_m),)  # ragged last block -> Pallas masked writeback
    row_map = lambda i: (i, 0)
    full_map = lambda i: (0, 0)    # constant -> resident blocks, no re-DMA

    flops = 2 * B * (D * H1 + H1 * H2p + H2p * C)
    bytes_accessed = (
        x.size * x.dtype.itemsize
        + sum(a.size * a.dtype.itemsize for a in (w1, b1, w2, b2, w3, b3))
        + B * C * 4
    )

    needed = _tile_vmem_bytes(block_m, D, H2p, C)
    vmem_limit = int(min(int(0.75 * vmem_cap),
                         max(32 * 1024 * 1024, needed + (8 << 20))))

    out = pl.pallas_call(
        _mlp_kernel,
        out_shape=jax.ShapeDtypeStruct((B, C), jnp.float32),
        grid_spec=pl.GridSpec(
            grid=grid,
            in_specs=[
                pl.BlockSpec((block_m, D), row_map),   # x tile [block_m, D] (f32)
                pl.BlockSpec(w1.shape, full_map),      # W1 [D, 128] bf16
                pl.BlockSpec(b1.shape, full_map),      # b1 [1, 128] f32
                pl.BlockSpec(w2.shape, full_map),      # W2 [128, 128] bf16 (padded)
                pl.BlockSpec(b2.shape, full_map),      # b2 [1, 128] f32   (padded)
                pl.BlockSpec(w3.shape, full_map),      # W3 [128, C] bf16  (rows padded)
                pl.BlockSpec(b3.shape, full_map),      # b3 [1, C]   f32
            ],
            out_specs=pl.BlockSpec((block_m, C), row_map),
        ),
        compiler_params=pltpu.CompilerParams(
            dimension_semantics=("parallel",),
            vmem_limit_bytes=vmem_limit,
        ),
        cost_estimate=pl.CostEstimate(
            flops=flops, transcendentals=0, bytes_accessed=bytes_accessed),
    )(x, w1, b1, w2, b2, w3, b3)

    return out


# ------------------------------ init & reference ------------------------------

def init_params(key, input_dim, num_classes):
    """Deterministic init mimicking PyTorch's default Linear init
    (uniform(-1/sqrt(fan_in), 1/sqrt(fan_in))). Weights stored [in, out]."""
    ks = jax.random.split(key, 6)

    def lin(kw, kb, fan_in, fan_out):
        bound = 1.0 / jnp.sqrt(fan_in)
        w = jax.random.uniform(kw, (fan_in, fan_out), jnp.float32, -bound, bound)
        b = jax.random.uniform(kb, (1, fan_out), jnp.float32, -bound, bound)
        return w, b

    w1, b1 = lin(ks[0], ks[1], input_dim, 128)
    w2, b2 = lin(ks[2], ks[3], 128, 64)
    w3, b3 = lin(ks[4], ks[5], 64, num_classes)
    return (w1, b1, w2, b2, w3, b3)


def reference_forward(x, params):
    w1, b1, w2, b2, w3, b3 = params
    h1 = jnp.maximum(x @ w1 + b1, 0.0)
    h2 = jnp.maximum(h1 @ w2 + b2, 0.0)
    return h2 @ w3 + b3


if __name__ == "__main__":
    key = jax.random.PRNGKey(0)
    k_x, k_p = jax.random.split(key)

    batch, input_dim, num_classes = 16, 32, 8
    x = jax.random.normal(k_x, (batch, input_dim), dtype=jnp.float32)
    params = init_params(k_p, input_dim, num_classes)

    prepared = prepare_params(params)              # one-time pad + bf16 cast
    out = nsl_model_forward(x, prepared)
    out = jax.block_until_ready(out)

    ref = reference_forward(x, params)
    assert out.shape == (batch, num_classes)
    # bf16 operands / f32 accumulation: loosened tolerance vs the f32 reference.
    assert jnp.allclose(out, ref, atol=3e-2, rtol=3e-2), "mismatch vs reference"

    print("KERNEL_OK")
</pallas_src>

<mosaic_0001>
module attributes {stable_mosaic.version = 11 : i64} {
  func.func @_mlp_kernel(%arg0: i32, %arg1: memref<16x32xf32, #tpu.memory_space<vmem>>, %arg2: memref<32x128xbf16, #tpu.memory_space<vmem>>, %arg3: memref<1x128xf32, #tpu.memory_space<vmem>>, %arg4: memref<128x128xbf16, #tpu.memory_space<vmem>>, %arg5: memref<1x128xf32, #tpu.memory_space<vmem>>, %arg6: memref<128x8xbf16, #tpu.memory_space<vmem>>, %arg7: memref<1x8xf32, #tpu.memory_space<vmem>>, %arg8: memref<16x8xf32, #tpu.memory_space<vmem>>) attributes {dimension_semantics = [#tpu.dimension_semantics<parallel>], iteration_bounds = array<i64: 1>, scalar_prefetch = 0 : i64, scratch_operands = 0 : i64, tpu.core_type = #tpu.core_type<tc>, window_params = [{transform_indices = @transform_0, window_bounds = array<i64: 16, 32>}, {pipeline_mode = #tpu.pipeline_mode<synchronous>, transform_indices = @transform_1, window_bounds = array<i64: 32, 128>}, {pipeline_mode = #tpu.pipeline_mode<synchronous>, transform_indices = @transform_2, window_bounds = array<i64: 1, 128>}, {pipeline_mode = #tpu.pipeline_mode<synchronous>, transform_indices = @transform_3, window_bounds = array<i64: 128, 128>}, {pipeline_mode = #tpu.pipeline_mode<synchronous>, transform_indices = @transform_4, window_bounds = array<i64: 1, 128>}, {pipeline_mode = #tpu.pipeline_mode<synchronous>, transform_indices = @transform_5, window_bounds = array<i64: 128, 8>}, {pipeline_mode = #tpu.pipeline_mode<synchronous>, transform_indices = @transform_6, window_bounds = array<i64: 1, 8>}, {transform_indices = @transform_7, window_bounds = array<i64: 16, 8>}]} {
    %c0 = arith.constant 0 : index
    %c0_0 = arith.constant 0 : index
    %0 = vector.load %arg1[%c0, %c0_0] : memref<16x32xf32, #tpu.memory_space<vmem>>, vector<16x32xf32>
    %1 = arith.truncf %0 : vector<16x32xf32> to vector<16x32xbf16>
    %c0_1 = arith.constant 0 : index
    %c0_2 = arith.constant 0 : index
    %2 = vector.load %arg2[%c0_1, %c0_2] : memref<32x128xbf16, #tpu.memory_space<vmem>>, vector<32x128xbf16>
    %cst = arith.constant dense<0.000000e+00> : vector<16x128xf32>
    %3 = tpu.matmul %1, %2, %cst {dimension_numbers = #tpu.dot_dimension_numbers<[1], [0], [0], [1], [0, 0, 1, 1], [], []>} : vector<16x32xbf16>, vector<32x128xbf16>, vector<16x128xf32> -> vector<16x128xf32>
    %c0_3 = arith.constant 0 : index
    %c0_4 = arith.constant 0 : index
    %4 = vector.load %arg3[%c0_3, %c0_4] : memref<1x128xf32, #tpu.memory_space<vmem>>, vector<1x128xf32>
    %5 = vector.broadcast %4 : vector<1x128xf32> to vector<16x128xf32>
    %6 = arith.addf %3, %5 : vector<16x128xf32>
    %cst_5 = arith.constant 0.000000e+00 : f32
    %7 = vector.broadcast %cst_5 : f32 to vector<16x128xf32>
    %8 = arith.maximumf %6, %7 : vector<16x128xf32>
    %9 = arith.truncf %8 : vector<16x128xf32> to vector<16x128xbf16>
    %c0_6 = arith.constant 0 : index
    %c0_7 = arith.constant 0 : index
    %10 = vector.load %arg4[%c0_6, %c0_7] : memref<128x128xbf16, #tpu.memory_space<vmem>>, vector<128x128xbf16>
    %cst_8 = arith.constant dense<0.000000e+00> : vector<16x128xf32>
    %11 = tpu.matmul %9, %10, %cst_8 {dimension_numbers = #tpu.dot_dimension_numbers<[1], [0], [0], [1], [0, 0, 1, 1], [], []>} : vector<16x128xbf16>, vector<128x128xbf16>, vector<16x128xf32> -> vector<16x128xf32>
    %c0_9 = arith.constant 0 : index
    %c0_10 = arith.constant 0 : index
    %12 = vector.load %arg5[%c0_9, %c0_10] : memref<1x128xf32, #tpu.memory_space<vmem>>, vector<1x128xf32>
    %13 = vector.broadcast %12 : vector<1x128xf32> to vector<16x128xf32>
    %14 = arith.addf %11, %13 : vector<16x128xf32>
    %cst_11 = arith.constant 0.000000e+00 : f32
    %15 = vector.broadcast %cst_11 : f32 to vector<16x128xf32>
    %16 = arith.maximumf %14, %15 : vector<16x128xf32>
    %17 = arith.truncf %16 : vector<16x128xf32> to vector<16x128xbf16>
    %c0_12 = arith.constant 0 : index
    %c0_13 = arith.constant 0 : index
    %18 = vector.load %arg6[%c0_12, %c0_13] : memref<128x8xbf16, #tpu.memory_space<vmem>>, vector<128x8xbf16>
    %cst_14 = arith.constant dense<0.000000e+00> : vector<16x8xf32>
    %19 = tpu.matmul %17, %18, %cst_14 {dimension_numbers = #tpu.dot_dimension_numbers<[1], [0], [0], [1], [0, 0, 1, 1], [], []>} : vector<16x128xbf16>, vector<128x8xbf16>, vector<16x8xf32> -> vector<16x8xf32>
    %c0_15 = arith.constant 0 : index
    %c0_16 = arith.constant 0 : index
    %20 = vector.load %arg7[%c0_15, %c0_16] : memref<1x8xf32, #tpu.memory_space<vmem>>, vector<1x8xf32>
    %21 = vector.broadcast %20 : vector<1x8xf32> to vector<16x8xf32>
    %22 = arith.addf %19, %21 : vector<16x8xf32>
    %c0_17 = arith.constant 0 : index
    %c0_18 = arith.constant 0 : index
    %23 = vector.load %arg8[%c0_17, %c0_18] : memref<16x8xf32, #tpu.memory_space<vmem>>, vector<16x8xf32>
    tpu.vector_store %arg8[%c0_17, %c0_18], %22 {strides = array<i32>} : memref<16x8xf32, #tpu.memory_space<vmem>>, vector<16x8xf32>,
    return
  }
  func.func @transform_0(%arg0: i32) -> (i32, i32) {
    %c0_i32 = arith.constant 0 : i32
    %c0_i32_0 = arith.constant 0 : i32
    return %arg0, %c0_i32 : i32, i32
  }
  func.func @transform_1(%arg0: i32) -> (i32, i32) {
    %c0_i32 = arith.constant 0 : i32
    %c0_i32_0 = arith.constant 0 : i32
    %c0_i32_1 = arith.constant 0 : i32
    return %c0_i32, %c0_i32_0 : i32, i32
  }
  func.func @transform_2(%arg0: i32) -> (i32, i32) {
    %c0_i32 = arith.constant 0 : i32
    %c0_i32_0 = arith.constant 0 : i32
    %c0_i32_1 = arith.constant 0 : i32
    return %c0_i32, %c0_i32_0 : i32, i32
  }
  func.func @transform_3(%arg0: i32) -> (i32, i32) {
    %c0_i32 = arith.constant 0 : i32
    %c0_i32_0 = arith.constant 0 : i32
    %c0_i32_1 = arith.constant 0 : i32
    return %c0_i32, %c0_i32_0 : i32, i32
  }
  func.func @transform_4(%arg0: i32) -> (i32, i32) {
    %c0_i32 = arith.constant 0 : i32
    %c0_i32_0 = arith.constant 0 : i32
    %c0_i32_1 = arith.constant 0 : i32
    return %c0_i32, %c0_i32_0 : i32, i32
  }
  func.func @transform_5(%arg0: i32) -> (i32, i32) {
    %c0_i32 = arith.constant 0 : i32
    %c0_i32_0 = arith.constant 0 : i32
    %c0_i32_1 = arith.constant 0 : i32
    return %c0_i32, %c0_i32_0 : i32, i32
  }
  func.func @transform_6(%arg0: i32) -> (i32, i32) {
    %c0_i32 = arith.constant 0 : i32
    %c0_i32_0 = arith.constant 0 : i32
    %c0_i32_1 = arith.constant 0 : i32
    return %c0_i32, %c0_i32_0 : i32, i32
  }
  func.func @transform_7(%arg0: i32) -> (i32, i32) {
    %c0_i32 = arith.constant 0 : i32
    %c0_i32_0 = arith.constant 0 : i32
    return %arg0, %c0_i32 : i32, i32
  }
}

</mosaic_0001>

<bundles_post_ra>
// kernel: tpu_custom_call.1
= control target key start
LH: loop header
LB: loop body
LE: loop exit
PB: predicated region body
PF: predicated region fallthrough
CT: control target
= control target key end

     0   :  { %12 = vsyncpa [#allocation3], 0  ;;  %s689_s0 = inlined_call_operand.hbm [shape: f32[16,32], index: 0, kind: input, shape index: {}]   ;;  %s690_s1 = inlined_call_operand.hbm [shape: bf16[32,128], index: 1, kind: input, shape index: {}]   ;;  %s691_s2 = inlined_call_operand.vmem [shape: f32[1,128], index: 2, kind: input, shape index: {}]   ;;  %s692_s3 = inlined_call_operand.vmem [shape: bf16[128,128], index: 3, kind: input, shape index: {}]   ;;  %s693_s4 = inlined_call_operand.vmem [shape: f32[1,128], index: 4, kind: input, shape index: {}]   ;;  %s694_s5 = inlined_call_operand.vmem [shape: bf16[128,8], index: 5, kind: input, shape index: {}]   ;;  %s695_s6 = inlined_call_operand.vmem [shape: f32[1,8], index: 6, kind: input, shape index: {}]   ;;  %s696_s7 = inlined_call_operand.vmem [shape: f32[16,8], index: 7, kind: output, shape index: {}]  }
   0x1   :  { %13 = vsyncpa [#allocation5], 0  ;;  %s530_s24 = smov [#allocation2]   ;;  %s482_s28 = scalar_lea.hbm %s689_s0, 256 }
   0x2   :  { %s19_s25 = sshll.u32 %s530_s24, 4  ;;  %p483_p0 = scmp.ne.s32.totalorder %s689_s0, %s482_s28  ;;  %s20_s25 = int_to_ptr.vmem [resolvable:$true] %s19_s25 }
   0x3   :  { %p486_p1 = scmp.lt.u32.totalorder %s482_s28, %s689_s0 }
   0x5   :  { %p488_p2 = pnand %p486_p1, %p483_p0 }
   0x7   :  { %491 = shalt.err (!%p488_p2)
}
   0x8   :  { %s492_s10 = scalar_lea.vmem %s20_s25, 256  ;;  %p497_p4 = scmp.lt.s32.totalorder %s20_s25, %s20_s25 }
   0x9   :  { %p493_p3 = scmp.ne.s32.totalorder %s20_s25, %s492_s10  ;;  %p498_p5 = scmp.lt.s32.totalorder %s492_s10, %s492_s10 }
   0xb   :  { %p499_p6 = por %p498_p5, %p497_p4 }
   0xd   :  { %p500_p7 = pnand %p499_p6, %p493_p3 }
   0xf   :  { %503 = shalt.err (!%p500_p7)
}
  0x10   :  { %s531_s11 = smov 128   ;;  %s532_s12 = smov 8  }
  0x11   :  { %25 = dma.hbm_to_vmem [thread:$0]  %s689_s0, 256, %s20_s25, [#allocation3], %s531_s11, %s531_s11, %s532_s12  }
  0x12   :  { %s533_s15 = smov [#allocation4]   ;;  %s504_s19 = scalar_lea.hbm %s690_s1, 256 }
  0x13   :  { %s31_s16 = sshll.u32 %s533_s15, 4  ;;  %p505_p8 = scmp.ne.s32.totalorder %s690_s1, %s504_s19  ;;  %s32_s16 = int_to_ptr.vmem [resolvable:$true] %s31_s16 }
  0x14   :  { %p508_p9 = scmp.lt.u32.totalorder %s504_s19, %s690_s1 }
  0x16   :  { %p510_p10 = pnand %p508_p9, %p505_p8 }
  0x18   :  { %513 = shalt.err (!%p510_p10)
}
  0x19   :  { %s514_s24 = scalar_lea.vmem %s32_s16, 256  ;;  %p519_p12 = scmp.lt.s32.totalorder %s32_s16, %s32_s16 }
  0x1a   :  { %p515_p11 = scmp.ne.s32.totalorder %s32_s16, %s514_s24  ;;  %p520_p13 = scmp.lt.s32.totalorder %s514_s24, %s514_s24 }
  0x1c   :  { %p521_p0 = por %p520_p13, %p519_p12 }
  0x1e   :  { %p522_p1 = pnand %p521_p0, %p515_p11 }
  0x20   :  { %525 = shalt.err (!%p522_p1)
}
  0x21   :  { %s534_s0 = smov 64   ;;  %s535_s25 = smov 4  }
  0x22   :  { %37 = dma.hbm_to_vmem [thread:$0]  %s690_s1, 256, %s32_s16, [#allocation5], %s534_s0, %s534_s0, %s535_s25  }
  0x23   :  { %526 = dma.done.wait [#allocation3], 256  }
  0x24   :  { %527 = vsyncadd [#allocation3], 4294967040 }
  0x25   :  { %528 = dma.done.wait [#allocation5], 256  }
  0x26   :  { %529 = vsyncadd [#allocation5], 4294967040  ;;  %v536_v0 = vmov 0.0   ;;  %vm537_vm0 = vmmov 0   ;;  %v464_v1 = vld [vmem:[#allocation4] sm:$0xff]   ;;  %v465_v2 = vld [vmem:[#allocation4 + $0x8] sm:$0xff]  }
  0x27   :  { %408 = vmatprep.subr.bf16.mxu0 %v536_v0  ;;  %412 = vmatprep.mubr.msk.bf16.mxu0 %vm537_vm0, %v536_v0  ;;  %v55_v3 = vld [vmem:[#allocation2] sm:$0xff]  ;;  %v56_v4 = vld [vmem:[#allocation2 + $0x8] sm:$0xff]  ;;  %vm81_vm1 = vcmask 261120   ;;  %v468_v8 = vld [vmem:[%s692_s3 + $0x10] sm:$0xff]   ;;  %vm356_vm2 = vcmask 64512  }
  0x28   :  { %416 = vmatprep.subr.bf16.mxu1 %v536_v0  ;;  %432 = vmatprep.mubr.msk.bf16.mxu1 %vm537_vm0, %v536_v0  ;;  %v466_v5 = vld [vmem:[%s692_s3] sm:$0xff]   ;;  %v57_v6 = vpack.c.bf16 %v56_v4, %v55_v3  ;;  %v467_v7 = vld [vmem:[%s692_s3 + $0x8] sm:$0xff]   ;;  %v469_v9 = vld [vmem:[%s692_s3 + $0x18] sm:$0xff]  }
  0x29   :  { %409 = vmatpush3.bf16.msra.mxu0 %v464_v1  ;;  %417 = vmatpush3.bf16.msra.mxu1 %v466_v5  ;;  %v470_v10 = vld [vmem:[%s692_s3 + $0x20] sm:$0xff]   ;;  %v471_v11 = vld [vmem:[%s692_s3 + $0x28] sm:$0xff]   ;;  %v472_v12 = vld [vmem:[%s692_s3 + $0x30] sm:$0xff]  }
  0x2a   :  { %410 = vmatprep.subr.bf16.mxu0 %v536_v0  ;;  %418 = vmatprep.subr.bf16.mxu1 %v536_v0  ;;  %v473_v13 = vld [vmem:[%s692_s3 + $0x38] sm:$0xff]   ;;  %v474_v14 = vld [vmem:[%s694_s5] sm:$0xff]   ;;  %v475_v15 = vld [vmem:[%s694_s5 + $0x8] sm:$0xff]  }
  0x2b   :  { %v476_v16 = vld [vmem:[%s694_s5 + $0x10] sm:$0xff]   ;;  %v477_v17 = vld [vmem:[%s694_s5 + $0x18] sm:$0xff]   ;;  %v478_v18 = vld [vmem:[%s694_s5 + $0x20] sm:$0xff]  }
  0x2c   :  { %v479_v19 = vld [vmem:[%s694_s5 + $0x28] sm:$0xff]   ;;  %v365_v20 = vld [vmem:[%s691_s2] ss:$0 sm:$0xff]  ;;  %v480_v30 = vld [vmem:[%s694_s5 + $0x30] sm:$0xff]  }
  0x2d   :  { %411 = vmatpush3.bf16.msra.mxu0 %v465_v2  ;;  %419 = vmatpush3.bf16.msra.mxu1 %v467_v7  ;;  %v481_v31 = vld [vmem:[%s694_s5 + $0x38] sm:$0xff]   ;;  %v369_v32 = vld [vmem:[%s693_s4] ss:$0 sm:$0xff] }
  0x2e   :  { %436 = vmatprep.subr.bf16.mxu0 %v536_v0  ;;  %420 = vmatprep.subr.bf16.mxu1 %v536_v0  ;;  %v378_v42 = vld [vmem:[%s695_s6] ss:$0 sm:$0xff] }
  0x30   :  { %413 = vmatmul.mubr.msk.bf16.vlgmr.msra.gmra.mrb[0].mxu0 %vm81_vm1, %v57_v6 }
  0x31   :  { %452 = vmatprep.mubr.msk.bf16.mxu0 %vm537_vm0, %v536_v0  ;;  %421 = vmatpush3.bf16.msra.mxu1 %v468_v8 }
  0x32   :  { %422 = vmatprep.subr.bf16.mxu1 %v536_v0  ;;  %437 = vmatpush3.bf16.msra.mxu0 %v474_v14 }
  0x33   :  { %438 = vmatprep.subr.bf16.mxu0 %v536_v0 }
  0x35   :  { %423 = vmatpush3.bf16.msra.mxu1 %v469_v9 }
  0x36   :  { %424 = vmatprep.subr.bf16.mxu1 %v536_v0  ;;  %439 = vmatpush3.bf16.msra.mxu0 %v475_v15 }
  0x37   :  { %440 = vmatprep.subr.bf16.mxu0 %v536_v0 }
  0x39   :  { %425 = vmatpush3.bf16.msra.mxu1 %v470_v10 }
  0x3a   :  { %426 = vmatprep.subr.bf16.mxu1 %v536_v0  ;;  %441 = vmatpush3.bf16.msra.mxu0 %v476_v16 }
  0x3b   :  { %442 = vmatprep.subr.bf16.mxu0 %v536_v0 }
  0x3d   :  { %427 = vmatpush3.bf16.msra.mxu1 %v471_v11 }
  0x3e   :  { %428 = vmatprep.subr.bf16.mxu1 %v536_v0  ;;  %443 = vmatpush3.bf16.msra.mxu0 %v477_v17 }
  0x3f   :  { %444 = vmatprep.subr.bf16.mxu0 %v536_v0 }
  0x41   :  { %429 = vmatpush3.bf16.msra.mxu1 %v472_v12 }
  0x42   :  { %430 = vmatprep.subr.bf16.mxu1 %v536_v0  ;;  %445 = vmatpush3.bf16.msra.mxu0 %v478_v18 }
  0x43   :  { %446 = vmatprep.subr.bf16.mxu0 %v536_v0 }
  0x45   :  { %431 = vmatpush3.bf16.msra.mxu1 %v473_v13 }
  0x46   :  { %447 = vmatpush3.bf16.msra.mxu0 %v479_v19 }
  0x47   :  { %448 = vmatprep.subr.bf16.mxu0 %v536_v0 }
  0x4a   :  { %449 = vmatpush3.bf16.msra.mxu0 %v480_v30 }
  0x4b   :  { %450 = vmatprep.subr.bf16.mxu0 %v536_v0 }
  0x4e   :  { %451 = vmatpush3.bf16.msra.mxu0 %v481_v31 }
 0x103   :  { %v119_v21 = vpop.f32.mrb[0].mxu0 }
 0x104   :  { %v120_v22 = vadd.f32 %v365_v20, %v119_v21  ;;  %v414_v23 = vpop.f32.mrb[1].mxu0 }
 0x105   :  { %v122_v24 = vpop.f32.mrb[2].mxu0 }
 0x106   :  { %v123_v25 = vadd.f32 %v365_v20, %v122_v24  ;;  %v415_v26 = vpop.f32.mrb[3].mxu0  ;;  %v126_v27 = vmax.f32 %v120_v22, 0.0 }
 0x108   :  { %v127_v28 = vmax.f32 %v123_v25, 0.0 }
 0x10a   :  { %v128_v29 = vpack.c.bf16 %v127_v28, %v126_v27 }
 0x10c   :  { %433 = vmatmul.mubr.bf16.vlgmr.msra.gmra.mrb[0].mxu1 %v128_v29 }
 0x1df   :  { %v234_v33 = vpop.f32.mrb[0].mxu1 }
 0x1e0   :  { %v235_v34 = vadd.f32 %v369_v32, %v234_v33  ;;  %v434_v35 = vpop.f32.mrb[1].mxu1 }
 0x1e1   :  { %v237_v36 = vpop.f32.mrb[2].mxu1 }
 0x1e2   :  { %v238_v37 = vadd.f32 %v369_v32, %v237_v36  ;;  %v435_v38 = vpop.f32.mrb[3].mxu1  ;;  %v241_v39 = vmax.f32 %v235_v34, 0.0 }
 0x1e4   :  { %v242_v40 = vmax.f32 %v238_v37, 0.0 }
 0x1e6   :  { %v243_v41 = vpack.c.bf16 %v242_v40, %v241_v39 }
 0x1e8   :  { %453 = vmatmul.mubr.bf16.vlgmr.msra.gmra.mrb[4].mxu0 %v243_v41 }
 0x2bb   :  { %v349_v43 = vpop.f32.mrb[4].mxu0 }
 0x2bc   :  { %v350_v44 = vadd.f32 %v378_v42, %v349_v43  ;;  %v454_v45 = vpop.f32.mrb[5].mxu0 }
 0x2bd   :  { %v352_v46 = vpop.f32.mrb[6].mxu0 }
 0x2be   :  { %357 = vst.msk [vmem:[%s696_s7] sm:$0xff] %vm356_vm2, %v350_v44  ;;  %v353_v47 = vadd.f32 %v378_v42, %v352_v46  ;;  %v455_v48 = vpop.f32.mrb[7].mxu0 }
 0x2c0   :  { %358 = vst.msk [vmem:[%s696_s7 + $0x8] sm:$0xff] %vm356_vm2, %v353_v47 }
 0x2c1   :  { %363 = vsyncpa [#allocation3], 1 }
 0x2c2   :  { %364 = vsyncpa [#allocation5], 1 }

</bundles_post_ra>
